<compile_context>
chip_gen: v6e
topology: v6e:2x2x1
jax: 0.10.0
libtpu: 0.0.40
codegen_flags: <defaults>
</compile_context>

<pallas_src>
import jax
import jax.numpy as jnp
from jax.experimental import pallas as pl
from jax.experimental.pallas import tpu as pltpu


def dqn_kernel(x_ref, w1_ref, b1_ref, w2_ref, b2_ref, w3_ref, b3_ref, o_ref):
    """x_ref: (tile, in) natural layout.  Wk: (out_k, in_k) PyTorch layout.
    bk: (out_k, 1).  o_ref: (out, tile) lane-dense (batch on the 128-lane axis)."""
    # Layer 1:  h1 = W1 @ x^T   (contract on in_features; MXU, f32 accumulate)
    h1 = jax.lax.dot_general(
        w1_ref[...], x_ref[...],
        dimension_numbers=(((1,), (1,)), ((), ())),
        preferred_element_type=jnp.float32)                      # (hidden, tile)
    h1 = jnp.maximum(h1 + b1_ref[...], 0.0)                      # f32 bias + ReLU
    # Layer 2 (activations stay f32 into the MXU)
    h2 = jnp.dot(w2_ref[...], h1, preferred_element_type=jnp.float32)  # (hidden, tile)
    h2 = jnp.maximum(h2 + b2_ref[...], 0.0)
    # Layer 3 (no activation)
    out = jnp.dot(w3_ref[...], h2, preferred_element_type=jnp.float32)  # (out, tile)
    o_ref[...] = (out + b3_ref[...]).astype(o_ref.dtype)


def _round_up(n, m):
    return ((n + m - 1) // m) * m


def dqn_forward(x, w1, b1, w2, b2, w3, b3, *, tile_b=4096, param_dtype=None):
    """x: (B, in) in its natural layout (f32 or bf16 — cast at the producer).
    wK: PyTorch-layout (out_features, in_features).  bK: (out_features,).
    Returns (B, out) f32, matching nn.Sequential(Linear, ReLU, Linear, ReLU, Linear)."""
    B, in_size = x.shape
    hidden = w1.shape[0]
    out_size = w3.shape[0]

    # Weights are ~7 KB: casting them wrapper-side is free.  x is NOT touched
    # here (no transpose / cast) — it streams straight from HBM.
    if param_dtype is not None:
        w1 = jnp.asarray(w1, param_dtype)
        w2 = jnp.asarray(w2, param_dtype)
        w3 = jnp.asarray(w3, param_dtype)
    b1c = jnp.asarray(b1, jnp.float32).reshape(hidden, 1)   # biases stay f32
    b2c = jnp.asarray(b2, jnp.float32).reshape(hidden, 1)
    b3c = jnp.asarray(b3, jnp.float32).reshape(out_size, 1)

    # ---- batch-tile selection: lane-aligned (multiple of 128), <128 cols waste,
    # ---- and >=2 tiles when the batch is big enough to feed both v7x cores.
    b128 = _round_up(B, 128)
    if b128 <= tile_b:
        nb, tile = 1, b128
        if b128 >= 2048:                       # big single block: split for v7x megacore
            tile = _round_up(pl.cdiv(b128, 2), 128)
            nb = pl.cdiv(b128, tile)
    else:
        nb = max(2, pl.cdiv(b128, tile_b))
        tile = _round_up(pl.cdiv(b128, nb), 128)
        nb = pl.cdiv(b128, tile)
    b_padded = nb * tile
    if b_padded != B:
        # Pad only the batch rows of x (zero rows produce relu(b) garbage that is
        # sliced off below); no transpose or dtype change of the x stream.
        x = jnp.pad(x, ((0, b_padded - B), (0, 0)))

    resident = lambda shape: pl.BlockSpec(shape, lambda i: (0, 0))  # VMEM-resident

    itemsize = lambda a: jnp.dtype(a.dtype).itemsize
    cost = pl.CostEstimate(
        flops=2 * b_padded * (in_size * hidden + hidden * hidden + hidden * out_size),
        transcendentals=0,
        bytes_accessed=(b_padded * in_size * itemsize(x)
                        + b_padded * out_size * 4
                        + (w1.size + w2.size + w3.size) * itemsize(w1)
                        + (hidden * 2 + out_size) * 4),
    )

    out_t = pl.pallas_call(
        dqn_kernel,
        out_shape=jax.ShapeDtypeStruct((out_size, b_padded), jnp.float32),
        grid=(nb,),
        in_specs=[
            pl.BlockSpec((tile, in_size), lambda i: (i, 0)),   # x: natural layout, tiled batch
            resident((hidden, in_size)),  resident((hidden, 1)),
            resident((hidden, hidden)),   resident((hidden, 1)),
            resident((out_size, hidden)), resident((out_size, 1)),
        ],
        out_specs=pl.BlockSpec((out_size, tile), lambda i: (0, i)),  # lane-dense output
        compiler_params=pltpu.CompilerParams(
            dimension_semantics=("parallel",),   # shard batch tiles across TCs on v7x
        ),
        cost_estimate=cost,
    )(x, w1, b1c, w2, b2c, w3, b3c)

    return out_t[:, :B].T                                      # tiny (out, B) -> (B, out)


def init_params(key, input_size, hidden_size, output_size):
    # Deterministic init mimicking nn.Linear: uniform(-1/sqrt(fan_in), 1/sqrt(fan_in)),
    # weights stored PyTorch-style as (out_features, in_features).
    ks = jax.random.split(key, 6)

    def lin(kw, kb, fan_in, fan_out):
        bound = 1.0 / jnp.sqrt(fan_in)
        w = jax.random.uniform(kw, (fan_out, fan_in), jnp.float32, -bound, bound)
        b = jax.random.uniform(kb, (fan_out,), jnp.float32, -bound, bound)
        return w, b

    w1, b1 = lin(ks[0], ks[1], input_size, hidden_size)
    w2, b2 = lin(ks[2], ks[3], hidden_size, hidden_size)
    w3, b3 = lin(ks[4], ks[5], hidden_size, output_size)
    return w1, b1, w2, b2, w3, b3


def ref_forward(x, w1, b1, w2, b2, w3, b3):
    hi = jax.lax.Precision.HIGHEST
    x = x.astype(jnp.float32)
    h1 = jnp.maximum(jnp.dot(x, w1.T, precision=hi) + b1, 0.0)
    h2 = jnp.maximum(jnp.dot(h1, w2.T, precision=hi) + b2, 0.0)
    return jnp.dot(h2, w3.T, precision=hi) + b3


if __name__ == "__main__":
    key = jax.random.PRNGKey(0)
    input_size, hidden_size, output_size = 16, 32, 4
    kp, kx1, kx2 = jax.random.split(key, 3)
    params = init_params(kp, input_size, hidden_size, output_size)

    # --- small batch, single (lane-padded) block, f32 ---
    batch = 8
    x = jax.random.normal(kx1, (batch, input_size), jnp.float32)
    out = jax.block_until_ready(dqn_forward(x, *params))
    ref = ref_forward(x, *params)
    assert out.shape == (batch, output_size)
    assert jnp.allclose(out, ref, atol=1e-3, rtol=1e-3), "f32 single-block mismatch"

    # --- tiled batch (grid of 2, with padding 200 -> 256), f32 ---
    batch2 = 200
    x2 = jax.random.normal(kx2, (batch2, input_size), jnp.float32)
    out2 = jax.block_until_ready(dqn_forward(x2, *params, tile_b=128))
    ref2 = ref_forward(x2, *params)
    assert out2.shape == (batch2, output_size)
    assert jnp.allclose(out2, ref2, atol=1e-3, rtol=1e-3), "f32 tiled mismatch"

    # --- bf16 storage for x (producer-side cast) and weights; f32 MXU accumulate,
    # --- f32 activations / bias / ReLU; loose tolerance vs f32 reference ---
    x2_bf16 = x2.astype(jnp.bfloat16)            # simulate a bf16 replay buffer
    out_bf16 = jax.block_until_ready(
        dqn_forward(x2_bf16, *params, tile_b=128, param_dtype=jnp.bfloat16))
    assert jnp.allclose(out_bf16, ref2, atol=5e-2, rtol=5e-2), "bf16 mismatch"

    print("KERNEL_OK")
</pallas_src>

<mosaic_0001>
module attributes {stable_mosaic.version = 11 : i64} {
  func.func @dqn_kernel(%arg0: i32, %arg1: memref<128x16xf32, #tpu.memory_space<vmem>>, %arg2: memref<32x16xf32, #tpu.memory_space<vmem>>, %arg3: memref<32x1xf32, #tpu.memory_space<vmem>>, %arg4: memref<32x32xf32, #tpu.memory_space<vmem>>, %arg5: memref<32x1xf32, #tpu.memory_space<vmem>>, %arg6: memref<4x32xf32, #tpu.memory_space<vmem>>, %arg7: memref<4x1xf32, #tpu.memory_space<vmem>>, %arg8: memref<4x128xf32, #tpu.memory_space<vmem>>) attributes {dimension_semantics = [#tpu.dimension_semantics<parallel>], iteration_bounds = array<i64: 1>, scalar_prefetch = 0 : i64, scratch_operands = 0 : i64, tpu.core_type = #tpu.core_type<tc>, window_params = [{transform_indices = @transform_0, window_bounds = array<i64: 128, 16>}, {pipeline_mode = #tpu.pipeline_mode<synchronous>, transform_indices = @transform_1, window_bounds = array<i64: 32, 16>}, {pipeline_mode = #tpu.pipeline_mode<synchronous>, transform_indices = @transform_2, window_bounds = array<i64: 32, 1>}, {pipeline_mode = #tpu.pipeline_mode<synchronous>, transform_indices = @transform_3, window_bounds = array<i64: 32, 32>}, {pipeline_mode = #tpu.pipeline_mode<synchronous>, transform_indices = @transform_4, window_bounds = array<i64: 32, 1>}, {pipeline_mode = #tpu.pipeline_mode<synchronous>, transform_indices = @transform_5, window_bounds = array<i64: 4, 32>}, {pipeline_mode = #tpu.pipeline_mode<synchronous>, transform_indices = @transform_6, window_bounds = array<i64: 4, 1>}, {transform_indices = @transform_7, window_bounds = array<i64: 4, 128>}]} {
    %c0 = arith.constant 0 : index
    %c0_0 = arith.constant 0 : index
    %0 = vector.load %arg2[%c0, %c0_0] : memref<32x16xf32, #tpu.memory_space<vmem>>, vector<32x16xf32>
    %c0_1 = arith.constant 0 : index
    %c0_2 = arith.constant 0 : index
    %1 = vector.load %arg1[%c0_1, %c0_2] : memref<128x16xf32, #tpu.memory_space<vmem>>, vector<128x16xf32>
    %cst = arith.constant dense<0.000000e+00> : vector<32x128xf32>
    %2 = tpu.matmul %0, %1, %cst {dimension_numbers = #tpu.dot_dimension_numbers<[1], [1], [0], [0], [0, 0, 1, 0], [], []>} : vector<32x16xf32>, vector<128x16xf32>, vector<32x128xf32> -> vector<32x128xf32>
    %c0_3 = arith.constant 0 : index
    %c0_4 = arith.constant 0 : index
    %3 = vector.load %arg3[%c0_3, %c0_4] : memref<32x1xf32, #tpu.memory_space<vmem>>, vector<32x1xf32>
    %4 = vector.broadcast %3 : vector<32x1xf32> to vector<32x128xf32>
    %5 = arith.addf %2, %4 : vector<32x128xf32>
    %cst_5 = arith.constant 0.000000e+00 : f32
    %6 = vector.broadcast %cst_5 : f32 to vector<32x128xf32>
    %7 = arith.maximumf %5, %6 : vector<32x128xf32>
    %c0_6 = arith.constant 0 : index
    %c0_7 = arith.constant 0 : index
    %8 = vector.load %arg4[%c0_6, %c0_7] : memref<32x32xf32, #tpu.memory_space<vmem>>, vector<32x32xf32>
    %cst_8 = arith.constant dense<0.000000e+00> : vector<32x128xf32>
    %9 = tpu.matmul %8, %7, %cst_8 {dimension_numbers = #tpu.dot_dimension_numbers<[1], [0], [0], [1], [0, 0, 1, 1], [], []>} : vector<32x32xf32>, vector<32x128xf32>, vector<32x128xf32> -> vector<32x128xf32>
    %c0_9 = arith.constant 0 : index
    %c0_10 = arith.constant 0 : index
    %10 = vector.load %arg5[%c0_9, %c0_10] : memref<32x1xf32, #tpu.memory_space<vmem>>, vector<32x1xf32>
    %11 = vector.broadcast %10 : vector<32x1xf32> to vector<32x128xf32>
    %12 = arith.addf %9, %11 : vector<32x128xf32>
    %cst_11 = arith.constant 0.000000e+00 : f32
    %13 = vector.broadcast %cst_11 : f32 to vector<32x128xf32>
    %14 = arith.maximumf %12, %13 : vector<32x128xf32>
    %c0_12 = arith.constant 0 : index
    %c0_13 = arith.constant 0 : index
    %15 = vector.load %arg6[%c0_12, %c0_13] : memref<4x32xf32, #tpu.memory_space<vmem>>, vector<4x32xf32>
    %cst_14 = arith.constant dense<0.000000e+00> : vector<4x128xf32>
    %16 = tpu.matmul %15, %14, %cst_14 {dimension_numbers = #tpu.dot_dimension_numbers<[1], [0], [0], [1], [0, 0, 1, 1], [], []>} : vector<4x32xf32>, vector<32x128xf32>, vector<4x128xf32> -> vector<4x128xf32>
    %c0_15 = arith.constant 0 : index
    %c0_16 = arith.constant 0 : index
    %17 = vector.load %arg7[%c0_15, %c0_16] : memref<4x1xf32, #tpu.memory_space<vmem>>, vector<4x1xf32>
    %18 = vector.broadcast %17 : vector<4x1xf32> to vector<4x128xf32>
    %19 = arith.addf %16, %18 : vector<4x128xf32>
    %c0_17 = arith.constant 0 : index
    %c0_18 = arith.constant 0 : index
    %20 = vector.load %arg8[%c0_17, %c0_18] : memref<4x128xf32, #tpu.memory_space<vmem>>, vector<4x128xf32>
    tpu.vector_store %arg8[%c0_17, %c0_18], %19 {strides = array<i32>} : memref<4x128xf32, #tpu.memory_space<vmem>>, vector<4x128xf32>,
    return
  }
  func.func @transform_0(%arg0: i32) -> (i32, i32) {
    %c0_i32 = arith.constant 0 : i32
    %c0_i32_0 = arith.constant 0 : i32
    return %arg0, %c0_i32 : i32, i32
  }
  func.func @transform_1(%arg0: i32) -> (i32, i32) {
    %c0_i32 = arith.constant 0 : i32
    %c0_i32_0 = arith.constant 0 : i32
    %c0_i32_1 = arith.constant 0 : i32
    return %c0_i32, %c0_i32_0 : i32, i32
  }
  func.func @transform_2(%arg0: i32) -> (i32, i32) {
    %c0_i32 = arith.constant 0 : i32
    %c0_i32_0 = arith.constant 0 : i32
    %c0_i32_1 = arith.constant 0 : i32
    return %c0_i32, %c0_i32_0 : i32, i32
  }
  func.func @transform_3(%arg0: i32) -> (i32, i32) {
    %c0_i32 = arith.constant 0 : i32
    %c0_i32_0 = arith.constant 0 : i32
    %c0_i32_1 = arith.constant 0 : i32
    return %c0_i32, %c0_i32_0 : i32, i32
  }
  func.func @transform_4(%arg0: i32) -> (i32, i32) {
    %c0_i32 = arith.constant 0 : i32
    %c0_i32_0 = arith.constant 0 : i32
    %c0_i32_1 = arith.constant 0 : i32
    return %c0_i32, %c0_i32_0 : i32, i32
  }
  func.func @transform_5(%arg0: i32) -> (i32, i32) {
    %c0_i32 = arith.constant 0 : i32
    %c0_i32_0 = arith.constant 0 : i32
    %c0_i32_1 = arith.constant 0 : i32
    return %c0_i32, %c0_i32_0 : i32, i32
  }
  func.func @transform_6(%arg0: i32) -> (i32, i32) {
    %c0_i32 = arith.constant 0 : i32
    %c0_i32_0 = arith.constant 0 : i32
    %c0_i32_1 = arith.constant 0 : i32
    return %c0_i32, %c0_i32_0 : i32, i32
  }
  func.func @transform_7(%arg0: i32) -> (i32, i32) {
    %c0_i32 = arith.constant 0 : i32
    %c0_i32_0 = arith.constant 0 : i32
    return %c0_i32, %arg0 : i32, i32
  }
}

</mosaic_0001>

<bundles_post_ra>
// kernel: tpu_custom_call.1
= control target key start
LH: loop header
LB: loop body
LE: loop exit
PB: predicated region body
PF: predicated region fallthrough
CT: control target
= control target key end

     0   :  { %vm71_vm0 = vcmask 130048   ;;  %v595_v2 = vmov 0   ;;  %s785_s0 = inlined_call_operand.vmem [shape: f32[128,16], index: 0, kind: input, shape index: {}]   ;;  %s786_s1 = inlined_call_operand.vmem [shape: f32[32,16], index: 1, kind: input, shape index: {}]   ;;  %s787_s2 = inlined_call_operand.vmem [shape: f32[32,1], index: 2, kind: input, shape index: {}]   ;;  %s788_s3 = inlined_call_operand.vmem [shape: f32[32,32], index: 3, kind: input, shape index: {}]   ;;  %s789_s4 = inlined_call_operand.vmem [shape: f32[32,1], index: 4, kind: input, shape index: {}]   ;;  %s790_s5 = inlined_call_operand.vmem [shape: f32[4,32], index: 5, kind: input, shape index: {}]   ;;  %s791_s6 = inlined_call_operand.vmem [shape: f32[4,1], index: 6, kind: input, shape index: {}]   ;;  %s792_s7 = inlined_call_operand.hbm [shape: f32[4,128], index: 7, kind: output, shape index: {}]  }
   0x1   :  { %v46_v0 = vld [vmem:[%s785_s0 + $0x78] sm:$0xff]  ;;  %v45_v1 = vld [vmem:[%s785_s0 + $0x70] sm:$0xff]  ;;  %571 = vset.pattern.permute.xlu0 %v595_v2  ;;  %572 = vset.pattern.permute.xlu1 %v595_v2  ;;  %v44_v3 = vld [vmem:[%s785_s0 + $0x68] sm:$0xff] }
   0x2   :  { %504 = vmatprep.subr.msk.mxu0 %vm71_vm0, %v46_v0  ;;  %v27_v4 = vld [vmem:[%s786_s1] sm:$0xff]  ;;  %v50_v5 = vld [vmem:[%s787_s2 + $0x18] sm:$0xff]  ;;  %v48_v6 = vld [vmem:[%s787_s2 + $0x8] sm:$0xff] }
   0x3   :  { %505 = vmatpush3.xpose.msk.msra.mxu0 %vm71_vm0, %v46_v0  ;;  %536 = vmatprep.mubr.msk.f32.mxu0 %vm71_vm0, %v27_v4  ;;  %v43_v7 = vld [vmem:[%s785_s0 + $0x60] sm:$0xff]  ;;  %v49_v8 = vld [vmem:[%s787_s2 + $0x10] sm:$0xff] }
   0x4   :  { %506 = vmatprep.subr.msk.mxu0 %vm71_vm0, %v45_v1  ;;  %68 = vperm.xlu0 %571, %v50_v5   ;;  %v47_v9 = vld [vmem:[%s787_s2] sm:$0xff] }
   0x5   :  { %58 = vperm.xlu1 %572, %v48_v6  }
   0x7   :  { %507 = vmatpush3.xpose.msk.msra.mxu0 %vm71_vm0, %v45_v1 }
   0x8   :  { %508 = vmatprep.subr.msk.mxu0 %vm71_vm0, %v44_v3 }
   0x9   :  { %12 = vsyncpa [#allocation3], 0  ;;  %63 = vperm.xlu0 %571, %v49_v8   ;;  %v42_v10 = vld [vmem:[%s785_s0 + $0x58] sm:$0xff]  ;;  %53 = vperm.xlu1 %572, %v47_v9   ;;  %v227_v12 = vld [vmem:[%s789_s4 + $0x10] sm:$0xff]  ;;  %vm249_vm1 = vcmask 261120   ;;  %v596_v50 = vmov 0.0  }
   0xa   :  { %v228_v11 = vld [vmem:[%s789_s4 + $0x18] sm:$0xff]  ;;  %v41_v13 = vld [vmem:[%s785_s0 + $0x50] sm:$0xff]  ;;  %v226_v14 = vld [vmem:[%s789_s4 + $0x8] sm:$0xff]  ;;  %vm597_vm2 = vmmov 0   ;;  %s598_s14 = smov [#allocation2]  }
   0xb   :  { %509 = vmatpush3.xpose.msk.msra.mxu0 %vm71_vm0, %v44_v3  ;;  %v225_v15 = vld [vmem:[%s789_s4] sm:$0xff]  ;;  %v40_v16 = vld [vmem:[%s785_s0 + $0x48] sm:$0xff]  ;;  %v38_v19 = vld [vmem:[%s785_s0 + $0x38] sm:$0xff]  ;;  %s438_s15 = sshll.u32 %s598_s14, 4  ;;  %s439_s15 = int_to_ptr.vmem [resolvable:$true] %s438_s15 }
   0xc   :  { %510 = vmatprep.subr.msk.mxu0 %vm71_vm0, %v43_v7  ;;  %v352_v17 = vld [vmem:[%s791_s6] sm:$0xf]  ;;  %v37_v20 = vld [vmem:[%s785_s0 + $0x30] sm:$0xff]  ;;  %v36_v21 = vld [vmem:[%s785_s0 + $0x28] sm:$0xff]  ;;  %s573_s16 = scalar_lea.vmem %s439_s15, 64  ;;  %p578_p1 = scmp.lt.s32.totalorder %s439_s15, %s439_s15 }
   0xd   :  { %246 = vperm.xlu0 %571, %v228_v11   ;;  %241 = vperm.xlu1 %572, %v227_v12   ;;  %v39_v18 = vld [vmem:[%s785_s0 + $0x40] sm:$0xff]  ;;  %v34_v23 = vld [vmem:[%s785_s0 + $0x18] sm:$0xff]  ;;  %v33_v24 = vld [vmem:[%s785_s0 + $0x10] sm:$0xff]  ;;  %p574_p0 = scmp.ne.s32.totalorder %s439_s15, %s573_s16  ;;  %p579_p2 = scmp.lt.s32.totalorder %s573_s16, %s573_s16 }
   0xe   :  { %v35_v22 = vld [vmem:[%s785_s0 + $0x20] sm:$0xff]  ;;  %v32_v25 = vld [vmem:[%s785_s0 + $0x8] sm:$0xff]  ;;  %v29_v28 = vld [vmem:[%s786_s1 + $0x10] sm:$0xff] }
   0xf   :  { %511 = vmatpush3.xpose.msk.msra.mxu0 %vm71_vm0, %v43_v7  ;;  %v31_v26 = vld [vmem:[%s785_s0] sm:$0xff]  ;;  %v28_v27 = vld [vmem:[%s786_s1 + $0x8] sm:$0xff]  ;;  %v30_v29 = vld [vmem:[%s786_s1 + $0x18] sm:$0xff]  ;;  %p580_p3 = por %p579_p2, %p578_p1 }
  0x10   :  { %512 = vmatprep.subr.msk.mxu0 %vm71_vm0, %v42_v10  ;;  %v221_v30 = vld [vmem:[%s788_s3] sm:$0xff]  ;;  %v222_v47 = vld [vmem:[%s788_s3 + $0x8] sm:$0xff]  ;;  %v223_v48 = vld [vmem:[%s788_s3 + $0x10] sm:$0xff] }
  0x11   :  { %236 = vperm.xlu0 %571, %v226_v14   ;;  %231 = vperm.xlu1 %572, %v225_v15   ;;  %v224_v49 = vld [vmem:[%s788_s3 + $0x18] sm:$0xff]  ;;  %v351_v3 = vld [vmem:[%s790_s5] sm:$0xf]  ;;  %p581_p4 = pnand %p580_p3, %p574_p0 }
  0x12   :  { %550 = vmatprep.mubr.msk.f32.mxu1 %vm249_vm1, %v221_v30 }
  0x13   :  { %513 = vmatpush3.xpose.msk.msra.mxu0 %vm71_vm0, %v42_v10 }
  0x14   :  { %514 = vmatprep.subr.msk.mxu0 %vm71_vm0, %v41_v13 }
  0x15   :  { %355 = vperm.xlu0 %571, %v352_v17  }
  0x17   :  { %515 = vmatpush3.xpose.msk.msra.mxu0 %vm71_vm0, %v41_v13 }
  0x18   :  { %516 = vmatprep.subr.msk.mxu0 %vm71_vm0, %v40_v16 }
  0x1b   :  { %517 = vmatpush3.xpose.msk.msra.mxu0 %vm71_vm0, %v40_v16 }
  0x1c   :  { %518 = vmatprep.subr.msk.mxu0 %vm71_vm0, %v39_v18 }
  0x1f   :  { %519 = vmatpush3.xpose.msk.msra.mxu0 %vm71_vm0, %v39_v18 }
  0x20   :  { %520 = vmatprep.subr.msk.mxu0 %vm71_vm0, %v38_v19 }
  0x23   :  { %521 = vmatpush3.xpose.msk.msra.mxu0 %vm71_vm0, %v38_v19 }
  0x24   :  { %522 = vmatprep.subr.msk.mxu0 %vm71_vm0, %v37_v20 }
  0x27   :  { %523 = vmatpush3.xpose.msk.msra.mxu0 %vm71_vm0, %v37_v20 }
  0x28   :  { %524 = vmatprep.subr.msk.mxu0 %vm71_vm0, %v36_v21 }
  0x2b   :  { %525 = vmatpush3.xpose.msk.msra.mxu0 %vm71_vm0, %v36_v21 }
  0x2c   :  { %526 = vmatprep.subr.msk.mxu0 %vm71_vm0, %v35_v22 }
  0x2f   :  { %527 = vmatpush3.xpose.msk.msra.mxu0 %vm71_vm0, %v35_v22 }
  0x30   :  { %528 = vmatprep.subr.msk.mxu0 %vm71_vm0, %v34_v23 }
  0x33   :  { %529 = vmatpush3.xpose.msk.msra.mxu0 %vm71_vm0, %v34_v23 }
  0x34   :  { %530 = vmatprep.subr.msk.mxu0 %vm71_vm0, %v33_v24 }
  0x37   :  { %531 = vmatpush3.xpose.msk.msra.mxu0 %vm71_vm0, %v33_v24 }
  0x38   :  { %532 = vmatprep.subr.msk.mxu0 %vm71_vm0, %v32_v25 }
  0x3b   :  { %533 = vmatpush3.xpose.msk.msra.mxu0 %vm71_vm0, %v32_v25 }
  0x3c   :  { %534 = vmatprep.subr.msk.mxu0 %vm71_vm0, %v31_v26 }
  0x3f   :  { %535 = vmatpush3.xpose.msk.msra.mxu0 %vm71_vm0, %v31_v26 }
  0x42   :  { %537 = vmatmul.mubr.msk.f32.vlgmr.msra.gmra.mxu0 %vm71_vm0, %v28_v27 }
  0x43   :  { %539 = vmatprep.mubr.msk.f32.mxu0 %vm71_vm0, %v29_v28 }
  0x46   :  { %540 = vmatmul.mubr.msk.f32.gmra.mxu0 %vm71_vm0, %v30_v29 }
  0x7f   :  { %v69_v31 = vpop.permute.xlu0 %68 }
  0x80   :  { %v59_v33 = vpop.permute.xlu1 %58 }
  0x84   :  { %v64_v37 = vpop.permute.xlu0 %63  ;;  %v54_v42 = vpop.permute.xlu1 %53 }
  0x88   :  { %v247_v51 = vpop.permute.xlu0 %246  ;;  %v242_v53 = vpop.permute.xlu1 %241 }
  0x8c   :  { %v237_v57 = vpop.permute.xlu0 %236  ;;  %v232_v62 = vpop.permute.xlu1 %231 }
  0x90   :  { %v356_v4 = vpop.permute.xlu0 %355 }
 0x102   :  { %v538_v32 = vpop.f32.mrf.mxu0 }
 0x103   :  { %v204_v39 = vadd.f32 %v538_v32, %v59_v33 }
 0x104   :  { %v198_v34 = vpop.f32.mrf.mxu0 }
 0x105   :  { %v199_v43 = vadd.f32 %v198_v34, %v54_v42  ;;  %v218_v45 = vmax.f32 %v204_v39, 0.0 }
 0x106   :  { %v541_v35 = vpop.f32.mrf.mxu0 }
 0x107   :  { %v214_v36 = vadd.f32 %v541_v35, %v69_v31  ;;  %v217_v46 = vmax.f32 %v199_v43, 0.0 }
 0x108   :  { %v208_v38 = vpop.f32.mrf.mxu0 }
 0x109   :  { %v220_v40 = vmax.f32 %v214_v36, 0.0  ;;  %v209_v41 = vadd.f32 %v208_v38, %v64_v37 }
 0x10b   :  { %v219_v44 = vmax.f32 %v209_v41, 0.0  ;;  %542 = vmatprep.subr.mxu1 %v220_v40 }
 0x10c   :  { %543 = vmatpush3.msra.mxu1 %v220_v40 }
 0x10d   :  { %544 = vmatprep.subr.mxu1 %v219_v44 }
 0x10e   :  { %545 = vmatpush3.msra.mxu1 %v219_v44 }
 0x10f   :  { %546 = vmatprep.subr.mxu1 %v218_v45 }
 0x110   :  { %547 = vmatpush3.msra.mxu1 %v218_v45 }
 0x111   :  { %548 = vmatprep.subr.mxu1 %v217_v46 }
 0x112   :  { %549 = vmatpush3.msra.mxu1 %v217_v46 }
 0x113   :  { %551 = vmatmul.mubr.msk.f32.vlgmr.msra.gmra.mxu1 %vm249_vm1, %v222_v47  ;;  %556 = vmatprep.subr.mxu1 %v596_v50 }
 0x114   :  { %553 = vmatprep.mubr.msk.f32.mxu1 %vm249_vm1, %v223_v48 }
 0x117   :  { %554 = vmatmul.mubr.msk.f32.gmra.mxu1 %vm249_vm1, %v224_v49 }
 0x118   :  { %564 = vmatprep.mubr.msk.f32.mxu1 %vm597_vm2, %v596_v50 }
 0x1d3   :  { %v552_v52 = vpop.f32.mrf.mxu1 }
 0x1d4   :  { %v334_v59 = vadd.f32 %v552_v52, %v237_v57 }
 0x1d5   :  { %v328_v54 = vpop.f32.mrf.mxu1 }
 0x1d6   :  { %v329_v63 = vadd.f32 %v328_v54, %v232_v62  ;;  %v348_v1 = vmax.f32 %v334_v59, 0.0 }
 0x1d7   :  { %v555_v55 = vpop.f32.mrf.mxu1 }
 0x1d8   :  { %v344_v56 = vadd.f32 %v555_v55, %v247_v51  ;;  %v347_v2 = vmax.f32 %v329_v63, 0.0 }
 0x1d9   :  { %v338_v58 = vpop.f32.mrf.mxu1 }
 0x1da   :  { %v350_v60 = vmax.f32 %v344_v56, 0.0  ;;  %v339_v61 = vadd.f32 %v338_v58, %v242_v53 }
 0x1dc   :  { %v349_v0 = vmax.f32 %v339_v61, 0.0  ;;  %557 = vmatpush3.msra.mxu1 %v350_v60 }
 0x1dd   :  { %558 = vmatprep.subr.mxu1 %v596_v50 }
 0x1de   :  { %559 = vmatpush3.msra.mxu1 %v349_v0 }
 0x1df   :  { %560 = vmatprep.subr.mxu1 %v596_v50 }
 0x1e0   :  { %561 = vmatpush3.msra.mxu1 %v348_v1 }
 0x1e1   :  { %562 = vmatprep.subr.mxu1 %v596_v50 }
 0x1e2   :  { %563 = vmatpush3.msra.mxu1 %v347_v2 }
 0x1e3   :  { %565 = vmatmul.mubr.msk.f32.vlgmr.msra.gmra.mxu1 %vm249_vm1, %v351_v3 }
 0x2a3   :  { %v427_v5 = vpop.f32.mrf.mxu1 }
 0x2a4   :  { %v428_v6 = vadd.f32 %v427_v5, %v356_v4 }
 0x2a5   :  { %v566_v7 = vpop.f32.mrf.mxu1 }
 0x2a6   :  { %431 = vst [vmem:[#allocation2] sm:$0xf] %v428_v6 }
 0x2a7   :  { %584 = shalt.err (!%p581_p4)
}
 0x2a8   :  { %441 = dma.vmem_to_hbm [thread:$0]  %s439_s15, 64, %s792_s7, [#allocation3]  }
 0x2a9   :  { %593 = dma.done.wait [#allocation3], 64  }
 0x2aa   :  { %594 = vsyncadd [#allocation3], 4294967232 }
 0x2ab   :  { %445 = vsyncpa [#allocation3], 1 }

</bundles_post_ra>
